<compile_context>
chip_gen: v6e
topology: v6e:2x2x1
jax: 0.10.0
libtpu: 0.0.40
codegen_flags: <defaults>
</compile_context>

<pallas_src>
import jax
import jax.numpy as jnp
from jax import lax
from jax.experimental import pallas as pl
from jax.experimental.pallas import tpu as pltpu

EPSILON = 1e-08
_VMEM_CAP_BYTES = 48 * 1024 * 1024  # stays inside v7x's 64 MiB physical VMEM


def _instance_norm_kernel(x_ref, o_ref):
    # x_ref / o_ref: (TB, H*W) — TB independent instances, full spatial plane
    # per row.  Reduction is strictly per-row (axis=-1), so garbage rows in a
    # ragged (masked-write) last block cannot contaminate any valid row.
    inv_hw = jnp.float32(1.0 / x_ref.shape[-1])          # true H*W (never padded)
    xf = x_ref[...].astype(jnp.float32)
    sumsq = jnp.sum(xf * xf, axis=-1, keepdims=True)      # (TB, 1), XLU reduce
    scale = lax.rsqrt(sumsq * inv_hw + jnp.float32(EPSILON))   # EUP
    # Re-cast from the VMEM input buffer instead of keeping `xf` live across
    # the reduction (halves f32 compute-temp pressure for bf16 inputs; free
    # for f32 — the data is already resident in the input buffer).
    o_ref[...] = (x_ref[...].astype(jnp.float32) * scale).astype(o_ref.dtype)


def _choose_block_rows(num_rows, row_len, itemsize):
    """Pick TB (rows per block).

    * multiple of the dtype's min sublane tile (8 f32 / 16 bf16 / 32 int8-fp8)
    * ~4 MiB per input block (amortizes the ~0.35 us/grid-step overhead on all
      generations; double-buffered in+out still fits v7x's 64 MiB VMEM)
    * aim for >= 4 total grid steps (>= 2 per TC on v7x with "parallel") as
      long as each block stays >= ~1 MiB.
    """
    sublane = max(8, 32 // max(1, itemsize))
    target_bytes = 4 * 1024 * 1024
    min_block_bytes = 1 * 1024 * 1024
    row_bytes = max(1, row_len * itemsize)

    rows = (target_bytes // row_bytes) // sublane * sublane
    rows = max(sublane, rows)
    rows_cap = pl.cdiv(num_rows, sublane) * sublane
    rows = min(rows, rows_cap)

    # Shrink by sublane-aligned halves until we have >= 4 grid steps, but never
    # below one sublane tile or ~1 MiB per block.
    while pl.cdiv(num_rows, rows) < 4:
        half = (rows // 2) // sublane * sublane
        if half < sublane or half * row_bytes < min_block_bytes:
            break
        rows = half
    return rows


def instance_norm_2d(x):
    """x: (N, C, H, W). Returns x * rsqrt(mean(x*x over H,W, keepdims) + eps)."""
    N, C, H, W = x.shape
    R = N * C
    L = H * W
    x2 = x.reshape(R, L)  # lane-dense: lane dim = H*W, one instance per row

    itemsize = jnp.dtype(x.dtype).itemsize
    tb = _choose_block_rows(R, L, itemsize)
    # TODO(synk): for very large spatial planes (a single (sublane, H*W) block
    # plus double buffers exceeding ~1/4 of the per-generation VMEM budget —
    # roughly half as large a threshold on v7x's 64 MiB as on v5e/v6e's
    # 128 MiB) a spatial-tiled two-phase reduction would be needed; not
    # required for the shapes this module is used with.

    # Scoped-VMEM limit sized from the actual block footprint:
    #   2x input + 2x output double buffers (input dtype) + 2 f32 temp slabs,
    # plus headroom; capped so it always fits v7x's 64 MiB physical VMEM.
    block_bytes = tb * L * itemsize
    vmem_bytes = 4 * block_bytes + 2 * tb * L * 4 + 4 * 1024 * 1024
    vmem_bytes = int(min(max(vmem_bytes, 8 * 1024 * 1024), _VMEM_CAP_BYTES))

    # No wrapper-side padding: grid = cdiv(R, tb) with a ragged last block.
    # Pallas masks out-of-range writes; the per-row reduction keeps garbage
    # rows from affecting any valid row.
    out2 = pl.pallas_call(
        _instance_norm_kernel,
        out_shape=jax.ShapeDtypeStruct((R, L), x.dtype),
        grid_spec=pltpu.PrefetchScalarGridSpec(
            num_scalar_prefetch=0,
            grid=(pl.cdiv(R, tb),),
            in_specs=[pl.BlockSpec((tb, L), lambda i: (i, 0))],
            out_specs=pl.BlockSpec((tb, L), lambda i: (i, 0)),
        ),
        compiler_params=pltpu.CompilerParams(
            dimension_semantics=("parallel",),
            vmem_limit_bytes=vmem_bytes,
        ),
    )(x2)

    return out2.reshape(N, C, H, W)


def instance_norm_2d_ref(x):
    xf = x.astype(jnp.float32)
    tmp = jnp.mean(xf * xf, axis=(2, 3), keepdims=True)
    return (xf * lax.rsqrt(tmp + EPSILON)).astype(x.dtype)


if __name__ == "__main__":
    key = jax.random.PRNGKey(0)
    x = jax.random.normal(key, (2, 4, 16, 16), dtype=jnp.float32)

    out = instance_norm_2d(x)
    out = jax.block_until_ready(out)

    ref = instance_norm_2d_ref(x)
    assert out.shape == x.shape and out.dtype == x.dtype
    assert jnp.allclose(out, ref, atol=1e-5, rtol=1e-5), "mismatch vs reference"

    print("KERNEL_OK")
</pallas_src>

<mosaic_0001>
module attributes {stable_mosaic.version = 11 : i64} {
  func.func @_instance_norm_kernel(%arg0: i32, %arg1: memref<8x256xf32, #tpu.memory_space<vmem>>, %arg2: memref<8x256xf32, #tpu.memory_space<vmem>>) attributes {dimension_semantics = [#tpu.dimension_semantics<parallel>], iteration_bounds = array<i64: 1>, scalar_prefetch = 0 : i64, scratch_operands = 0 : i64, tpu.core_type = #tpu.core_type<tc>, window_params = [{transform_indices = @transform_0, window_bounds = array<i64: 8, 256>}, {transform_indices = @transform_1, window_bounds = array<i64: 8, 256>}]} {
    %c0 = arith.constant 0 : index
    %c0_0 = arith.constant 0 : index
    %0 = vector.load %arg1[%c0, %c0_0] : memref<8x256xf32, #tpu.memory_space<vmem>>, vector<8x256xf32>
    %1 = arith.mulf %0, %0 : vector<8x256xf32>
    %cst = arith.constant dense<0.000000e+00> : vector<8xf32>
    %2 = vector.multi_reduction <add>, %1, %cst [1] : vector<8x256xf32> to vector<8xf32>
    %3 = vector.shape_cast %2 : vector<8xf32> to vector<8x1xf32>
    %cst_1 = arith.constant 3.906250e-03 : f32
    %4 = vector.broadcast %cst_1 : f32 to vector<8x1xf32>
    %5 = arith.mulf %3, %4 : vector<8x1xf32>
    %cst_2 = arith.constant 9.99999993E-9 : f32
    %6 = vector.broadcast %cst_2 : f32 to vector<8x1xf32>
    %7 = arith.addf %5, %6 : vector<8x1xf32>
    %8 = math.rsqrt %7 : vector<8x1xf32>
    %c0_3 = arith.constant 0 : index
    %c0_4 = arith.constant 0 : index
    %9 = vector.load %arg1[%c0_3, %c0_4] : memref<8x256xf32, #tpu.memory_space<vmem>>, vector<8x256xf32>
    %10 = vector.broadcast %8 : vector<8x1xf32> to vector<8x256xf32>
    %11 = arith.mulf %9, %10 : vector<8x256xf32>
    %c0_5 = arith.constant 0 : index
    %c0_6 = arith.constant 0 : index
    %12 = vector.load %arg2[%c0_5, %c0_6] : memref<8x256xf32, #tpu.memory_space<vmem>>, vector<8x256xf32>
    tpu.vector_store %arg2[%c0_5, %c0_6], %11 {strides = array<i32>} : memref<8x256xf32, #tpu.memory_space<vmem>>, vector<8x256xf32>,
    return
  }
  func.func @transform_0(%arg0: i32) -> (i32, i32) {
    %c0_i32 = arith.constant 0 : i32
    %c0_i32_0 = arith.constant 0 : i32
    return %arg0, %c0_i32 : i32, i32
  }
  func.func @transform_1(%arg0: i32) -> (i32, i32) {
    %c0_i32 = arith.constant 0 : i32
    %c0_i32_0 = arith.constant 0 : i32
    return %arg0, %c0_i32 : i32, i32
  }
}

</mosaic_0001>

<bundles_post_ra>
// kernel: tpu_custom_call.1
= control target key start
LH: loop header
LB: loop body
LE: loop exit
PB: predicated region body
PF: predicated region fallthrough
CT: control target
= control target key end

     0   :  { %6 = vsyncpa [#allocation3], 0  ;;  %s116_s0 = inlined_call_operand.hbm [shape: f32[8,256], index: 0, kind: input, shape index: {}]   ;;  %s117_s1 = inlined_call_operand.hbm [shape: f32[8,256], index: 1, kind: output, shape index: {}]  }
   0x1   :  { %7 = vsyncpa [#allocation4], 0  ;;  %s98_s6 = smov [#allocation2]  }
   0x2   :  { %s14_s7 = sshll.u32 %s98_s6, 4  ;;  %s15_s7 = int_to_ptr.vmem [resolvable:$true] %s14_s7 }
   0x3   :  { %s62_s8 = scalar_lea.vmem %s15_s7, 256  ;;  %p67_p1 = scmp.lt.s32.totalorder %s15_s7, %s15_s7 }
   0x4   :  { %p63_p0 = scmp.ne.s32.totalorder %s15_s7, %s62_s8  ;;  %p68_p2 = scmp.lt.s32.totalorder %s62_s8, %s62_s8 }
   0x6   :  { %p69_p3 = por %p68_p2, %p67_p1 }
   0x8   :  { %p70_p4 = pnand %p69_p3, %p63_p0 }
   0xa   :  { %73 = shalt.err (!%p70_p4)
}
   0xb   :  { %17 = dma.hbm_to_vmem [thread:$0]  %s116_s0, 256, %s15_s7, [#allocation3]  }
   0xc   :  { %94 = dma.done.wait [#allocation3], 256  }
   0xd   :  { %95 = vsyncadd [#allocation3], 4294967040  ;;  %v21_v0 = vld [vmem:[#allocation2] sm:$0xff]  ;;  %v22_v1 = vld [vmem:[#allocation2 + $0x8] sm:$0xff]  ;;  %s99_s11 = smov [#allocation5]  }
   0xe   :  { %v23_v2 = vmul.f32 %v21_v0, %v21_v0  ;;  %v24_v3 = vmul.f32 %v22_v1, %v22_v1  ;;  %s41_s12 = sshll.u32 %s99_s11, 4  ;;  %s42_s12 = int_to_ptr.vmem [resolvable:$true] %s41_s12 }
   0xf   :  { %s74_s0 = scalar_lea.vmem %s42_s12, 256  ;;  %p79_p6 = scmp.lt.s32.totalorder %s42_s12, %s42_s12 }
  0x10   :  { %v25_v4 = vadd.f32 %v24_v3, %v23_v2  ;;  %p75_p5 = scmp.ne.s32.totalorder %s42_s12, %s74_s0  ;;  %p80_p7 = scmp.lt.s32.totalorder %s74_s0, %s74_s0 }
  0x12   :  { %26 = vadd.xlane.f32.xlu0 %v25_v4  ;;  %p81_p8 = por %p80_p7, %p79_p6 }
  0x14   :  { %p82_p9 = pnand %p81_p8, %p75_p5 }
  0x9b   :  { %v27_v5 = vpop.xlane.xlu0 %26 }
  0x9c   :  { %v28_v6 = vmul.f32 0.00390625, %v27_v5 }
  0x9e   :  { %v29_v7 = vadd.f32 1e-08, %v28_v6 }
  0xa0   :  { %52 = vrsqrt.f32 %v29_v7 }
  0xad   :  { %v53_v8 = vpop.eup %52 }
  0xae   :  { %v31_v9 = vmul.f32 %v53_v8, %v21_v0  ;;  %v32_v10 = vmul.f32 %v53_v8, %v22_v1 }
  0xb0   :  { %33 = vst [vmem:[#allocation5] sm:$0xff] %v31_v9  ;;  %34 = vst [vmem:[#allocation5 + $0x8] sm:$0xff] %v32_v10 }
  0xb1   :  { %85 = shalt.err (!%p82_p9)
}
  0xb2   :  { %44 = dma.vmem_to_hbm [thread:$0]  %s42_s12, 256, %s117_s1, [#allocation4]  }
  0xb3   :  { %96 = dma.done.wait [#allocation4], 256  }
  0xb4   :  { %97 = vsyncadd [#allocation4], 4294967040 }
  0xb5   :  { %48 = vsyncpa [#allocation3], 1 }
  0xb6   :  { %49 = vsyncpa [#allocation4], 1 }

</bundles_post_ra>
